<compile_context>
chip_gen: v6e
topology: v6e:2x2x1
jax: 0.10.0
libtpu: 0.0.40
codegen_flags: <defaults>
</compile_context>

<pallas_src>
import functools

import jax
import jax.numpy as jnp
from jax.experimental import pallas as pl
from jax.experimental.pallas import tpu as pltpu


def _patchify_matmul_kernel(x_ref, w_ref, b_ref, o_ref):
    # x_ref: (K, tm) bf16 streamed, w_ref: (Cout, K) bf16 resident,
    # b_ref: (Cout, 1) f32 resident, o_ref: (Cout, tm) f32 (lane-dense along tm).
    acc = jnp.dot(w_ref[...], x_ref[...], preferred_element_type=jnp.float32)
    o_ref[...] = (acc + b_ref[...]).astype(o_ref.dtype)


def _choose_tile_m(M, max_tm=8192):
    """Pick (tm, M_pad) with tm a multiple of 128 (lane dim of both the streamed
    patches block and the output block).

    Preference order:
      1) padding overhead <= 10% (or the minimum achievable),
      2) an even number of grid steps (keeps v7x's two TensorCores balanced;
         costs nothing on single-core v5e/v6e),
      3) fewest grid steps (amortize per-step pipeline overhead),
      4) least padding.
    """
    LANE = 128
    m_up = ((M + LANE - 1) // LANE) * LANE          # minimum padded extent
    cap = max(LANE, min(max_tm - max_tm % LANE, m_up))
    best_key, best = None, None
    for tm in range(LANE, cap + LANE, LANE):
        steps = -(-M // tm)                          # cdiv
        m_pad = steps * tm
        pad_frac = (m_pad - M) / M
        key = (0.0 if pad_frac <= 0.10 else pad_frac,
               0 if steps % 2 == 0 else 1,
               steps,
               m_pad)
        if best_key is None or key < best_key:
            best_key, best = key, (tm, m_pad)
    return best


def conv2d_patchify_pallas(x_nchw, weight, bias, *, kernel_size=4, stride=4,
                           max_tm=8192):
    """Conv2d with kernel_size == stride (patchify conv) via a Pallas MXU matmul.

    x_nchw: (N, Cin, H, W) float32
    weight: (Cout, Cin, kh, kw) float32
    bias:   (Cout,) float32
    returns (N, Cout, H//kh, W//kw) float32
    """
    N, Cin, H, W = x_nchw.shape
    Cout, Cin_w, kh, kw = weight.shape
    assert Cin == Cin_w and kh == kernel_size and kw == kernel_size
    assert stride == kernel_size
    assert H % kh == 0 and W % kw == 0
    Ho, Wo = H // kh, W // kw
    K = Cin * kh * kw
    M = N * Ho * Wo

    # --- patch extraction: free reshapes + ONE 6-D transpose + bf16 cast (single
    # fused XLA copy).  K is ordered (Cin, kh, kw), M is ordered (N, Ho, Wo). ---
    patches = x_nchw.reshape(N, Cin, Ho, kh, Wo, kw)
    patches = jnp.transpose(patches, (1, 3, 5, 0, 2, 4))   # (Cin, kh, kw, N, Ho, Wo)
    patches = patches.reshape(K, M).astype(jnp.bfloat16)

    # Weight needs only a reshape (natural (Cin, kh, kw) K-order) -- no transpose.
    w_mat = weight.reshape(Cout, K).astype(jnp.bfloat16)    # (Cout, K)
    b_mat = bias.reshape(Cout, 1).astype(jnp.float32)       # (Cout, 1)

    tm, M_pad = _choose_tile_m(M, max_tm)
    if M_pad != M:
        # Padded columns are zero patches; the kernel turns them into `bias`
        # (0 @ W + b), NOT zero.  They are sliced off below -- keep the slice.
        patches = jnp.pad(patches, ((0, 0), (0, M_pad - M)))

    out = pl.pallas_call(
        _patchify_matmul_kernel,
        out_shape=jax.ShapeDtypeStruct((Cout, M_pad), jnp.float32),
        grid_spec=pltpu.PrefetchScalarGridSpec(
            num_scalar_prefetch=0,
            grid=(M_pad // tm,),
            in_specs=[
                pl.BlockSpec((K, tm), lambda i: (0, i)),      # streamed patches (bf16)
                pl.BlockSpec((Cout, K), lambda i: (0, 0)),    # resident weight (bf16)
                pl.BlockSpec((Cout, 1), lambda i: (0, 0)),    # resident bias (f32)
            ],
            out_specs=pl.BlockSpec((Cout, tm), lambda i: (0, i)),
        ),
        compiler_params=pltpu.CompilerParams(
            dimension_semantics=("parallel",),
            vmem_limit_bytes=32 * 1024 * 1024,
        ),
    )(patches, w_mat, b_mat)

    # Channel-major (Cout, M) -> NCHW.  The M slice (when padded) copies contiguous
    # rows; the (1,0,2,3) permute moves whole Ho*Wo-contiguous chunks and is a pure
    # reshape when N == 1.  Far cheaper than v2's NHWC->NCHW transpose.
    if M_pad != M:
        out = out[:, :M]
    out = out.reshape(Cout, N, Ho, Wo)
    return jnp.transpose(out, (1, 0, 2, 3))


def reference_conv(x_nchw, weight, bias, stride=4):
    y = jax.lax.conv_general_dilated(
        x_nchw, weight,
        window_strides=(stride, stride),
        padding="VALID",
        dimension_numbers=("NCHW", "OIHW", "NCHW"),
    )
    return y + bias.reshape(1, -1, 1, 1)


if __name__ == "__main__":
    key = jax.random.PRNGKey(0)
    kx, kw_key, kb_key = jax.random.split(key, 3)

    # Small shapes consistent with the module: Conv2d(3, 96, kernel_size=4, stride=4).
    N, Cin, H, W = 2, 3, 64, 64
    Cout, ksz = 96, 4

    x = jax.random.normal(kx, (N, Cin, H, W), dtype=jnp.float32)
    fan_in = Cin * ksz * ksz
    bound = 1.0 / (fan_in ** 0.5)
    weight = jax.random.uniform(kw_key, (Cout, Cin, ksz, ksz), jnp.float32,
                                minval=-bound, maxval=bound)
    bias = jax.random.uniform(kb_key, (Cout,), jnp.float32,
                              minval=-bound, maxval=bound)

    # M = 2*16*16 = 512 here -> tile chooser picks tm = 256 (2 grid steps), so the
    # small demo still exercises a multi-step pipelined grid.
    conv_fn = jax.jit(functools.partial(conv2d_patchify_pallas,
                                        kernel_size=ksz, stride=ksz))
    out = jax.block_until_ready(conv_fn(x, weight, bias))

    ref = jax.block_until_ready(reference_conv(x, weight, bias, stride=ksz))
    assert out.shape == (N, Cout, H // ksz, W // ksz), out.shape
    # bf16 matmul inputs with fp32 accumulation -> loose-ish tolerance vs fp32 ref.
    max_err = float(jnp.max(jnp.abs(out - ref)))
    assert jnp.allclose(out, ref, atol=5e-2, rtol=5e-2), f"mismatch, max_err={max_err}"

    print("KERNEL_OK")
</pallas_src>

<mosaic_0001>
module attributes {stable_mosaic.version = 11 : i64} {
  func.func @_patchify_matmul_kernel(%arg0: i32, %arg1: memref<48x256xbf16, #tpu.memory_space<vmem>>, %arg2: memref<96x48xbf16, #tpu.memory_space<vmem>>, %arg3: memref<96x1xf32, #tpu.memory_space<vmem>>, %arg4: memref<96x256xf32, #tpu.memory_space<vmem>>) attributes {dimension_semantics = [#tpu.dimension_semantics<parallel>], iteration_bounds = array<i64: 2>, scalar_prefetch = 0 : i64, scratch_operands = 0 : i64, tpu.core_type = #tpu.core_type<tc>, window_params = [{transform_indices = @transform_0, window_bounds = array<i64: 48, 256>}, {pipeline_mode = #tpu.pipeline_mode<synchronous>, transform_indices = @transform_1, window_bounds = array<i64: 96, 48>}, {pipeline_mode = #tpu.pipeline_mode<synchronous>, transform_indices = @transform_2, window_bounds = array<i64: 96, 1>}, {transform_indices = @transform_3, window_bounds = array<i64: 96, 256>}]} {
    %c0 = arith.constant 0 : index
    %c0_0 = arith.constant 0 : index
    %0 = vector.load %arg2[%c0, %c0_0] : memref<96x48xbf16, #tpu.memory_space<vmem>>, vector<96x48xbf16>
    %c0_1 = arith.constant 0 : index
    %c0_2 = arith.constant 0 : index
    %1 = vector.load %arg1[%c0_1, %c0_2] : memref<48x256xbf16, #tpu.memory_space<vmem>>, vector<48x256xbf16>
    %cst = arith.constant dense<0.000000e+00> : vector<96x256xf32>
    %2 = tpu.matmul %0, %1, %cst {dimension_numbers = #tpu.dot_dimension_numbers<[1], [0], [0], [1], [0, 0, 1, 1], [], []>} : vector<96x48xbf16>, vector<48x256xbf16>, vector<96x256xf32> -> vector<96x256xf32>
    %c0_3 = arith.constant 0 : index
    %c0_4 = arith.constant 0 : index
    %3 = vector.load %arg3[%c0_3, %c0_4] : memref<96x1xf32, #tpu.memory_space<vmem>>, vector<96x1xf32>
    %4 = vector.broadcast %3 : vector<96x1xf32> to vector<96x256xf32>
    %5 = arith.addf %2, %4 : vector<96x256xf32>
    %c0_5 = arith.constant 0 : index
    %c0_6 = arith.constant 0 : index
    %6 = vector.load %arg4[%c0_5, %c0_6] : memref<96x256xf32, #tpu.memory_space<vmem>>, vector<96x256xf32>
    tpu.vector_store %arg4[%c0_5, %c0_6], %5 {strides = array<i32>} : memref<96x256xf32, #tpu.memory_space<vmem>>, vector<96x256xf32>,
    return
  }
  func.func @transform_0(%arg0: i32) -> (i32, i32) {
    %c0_i32 = arith.constant 0 : i32
    %c0_i32_0 = arith.constant 0 : i32
    return %c0_i32, %arg0 : i32, i32
  }
  func.func @transform_1(%arg0: i32) -> (i32, i32) {
    %c0_i32 = arith.constant 0 : i32
    %c0_i32_0 = arith.constant 0 : i32
    %c0_i32_1 = arith.constant 0 : i32
    return %c0_i32, %c0_i32_0 : i32, i32
  }
  func.func @transform_2(%arg0: i32) -> (i32, i32) {
    %c0_i32 = arith.constant 0 : i32
    %c0_i32_0 = arith.constant 0 : i32
    %c0_i32_1 = arith.constant 0 : i32
    return %c0_i32, %c0_i32_0 : i32, i32
  }
  func.func @transform_3(%arg0: i32) -> (i32, i32) {
    %c0_i32 = arith.constant 0 : i32
    %c0_i32_0 = arith.constant 0 : i32
    return %c0_i32, %arg0 : i32, i32
  }
}

</mosaic_0001>

<bundles_post_ra>
// kernel: conv2d_patchify_pallas.1
= control target key start
LH: loop header
LB: loop body
LE: loop exit
PB: predicated region body
PF: predicated region fallthrough
CT: control target
= control target key end

     0   :  { %s766_s12 = smov 0   ;;  %s768_s13 = smov 0   ;;  %s974_s0 = inlined_call_operand.vmem [shape: bf16[48,512], index: 0, kind: input, shape index: {}]   ;;  %s975_s1 = inlined_call_operand.vmem [shape: bf16[96,48], index: 1, kind: input, shape index: {}]   ;;  %s976_s2 = inlined_call_operand.vmem [shape: f32[96,1], index: 2, kind: input, shape index: {}]   ;;  %s977_s3 = inlined_call_operand.vmem [shape: f32[96,512], index: 3, kind: output, shape index: {}]  }
   0x1   :  { %s770_s14 = smov 0  }
   0x2 LB: > { %s639_s15 = sadd.s32 4294967295, %s743_s14   ;;  %s783_s16 = sadd.s32 1, %s743_s14   ;;  %s743_s14 = sphi %s770_s14, %s981_s14   ;;  %s739_s13 = sphi %s768_s13, %s980_s13   ;;  %s735_s12 = sphi %s766_s12, %s979_s12  }
   0x3   : > { %s17_s17 = ssub.s32 %s743_s14, %s783_s16  ;;  %s20_s18 = sadd.s32 1, %s739_s13 }
   0x4   : > { %p18_p0 = scmp.eq.s32.totalorder %s17_s17, 0  ;;  %p27_p1 = scmp.ne.s32.totalorder %s739_s13, %s735_s12 }
   0x5   : > { %p28_p2 = scmp.eq.s32.totalorder %s743_s14, 0  ;;  %p99_p3 = scmp.eq.s32.totalorder %s639_s15, 1 }
   0x6   : > { %s794_s19 = scalar_select %p18_p0, %s739_s13, %s20_s18  }
   0x7   : > { %p29_p4 = por %p28_p2, %p27_p1  ;;  %p796_p5 = por %p99_p3, %p27_p1 }
   0x8   : > { %p642_p6 = scmp.ge.s32.totalorder %s743_s14, 2 }
   0xa   : > { %127 = sbr.rel (%p642_p6) target bundleno = 22 (0x16), region = 24 }
   0xf   : > { %130 = sbr.rel (!%p29_p4) target bundleno = 22 (0x16), region = 28  ;;  %s132_s21 = sand.u32 (%p29_p4), 1, %s739_s13  }
  0x10   : > { %s668_s22 = sshll.u32 (%p29_p4), %s743_s14, 3  ;;  %s676_s23 = smul.u32 (%p29_p4), 48, %s132_s21 }
  0x11   : > { %s137_s26 = scalar_lea.vmem (%p29_p4), %s974_s0, %s668_s22 }
  0x12   : > { %v176_v0 = vld [vmem:[%s137_s26] sm:$0xff] (%p29_p4)  ;;  %v178_v1 = vld [vmem:[%s137_s26 + $0x10] sm:$0xff] (%p29_p4)  ;;  %s134_s27 = scalar_lea.vmem (%p29_p4), [#allocation2], %s676_s23 }
  0x13   : > { %v180_v2 = vld [vmem:[%s137_s26 + $0x20] sm:$0xff] (%p29_p4)  ;;  %v182_v3 = vld [vmem:[%s137_s26 + $0x30] sm:$0xff] (%p29_p4)  ;;  %177 = vst [vmem:[%s134_s27] sm:$0xff] (%p29_p4), %v176_v0  ;;  %179 = vst [vmem:[%s134_s27 + $0x8] sm:$0xff] (%p29_p4), %v178_v1 }
  0x14   : > { %v184_v4 = vld [vmem:[%s137_s26 + $0x40] sm:$0xff]  ;;  %v186_v5 = vld [vmem:[%s137_s26 + $0x50] sm:$0xff]  ;;  %181 = vst [vmem:[%s134_s27 + $0x10] sm:$0xff] %v180_v2  ;;  %183 = vst [vmem:[%s134_s27 + $0x18] sm:$0xff] %v182_v3 }
  0x15   : > { %185 = vst [vmem:[%s134_s27 + $0x20] sm:$0xff] %v184_v4  ;;  %187 = vst [vmem:[%s134_s27 + $0x28] sm:$0xff] %v186_v5 }
  0x16 PF: > { %p645_p7 = scmp.ge.s32.totalorder %s743_s14, 1  ;;  %p192_p8 = scmp.lt.s32.totalorder %s743_s14, 3 }
  0x18   : > { %p193_p9 = pnand %p645_p7, %p192_p8 }
  0x19   : > { %s199_s28 = sand.u32 (!%p193_p9), 1, %s735_s12  }
  0x1a   : > { %196 = sbr.rel (%p193_p9) target bundleno = 273 (0x111), region = 66 }
  0x1b   : > { %s677_s29 = smul.u32 (!%p193_p9), 48, %s199_s28 }
  0x1d   : > { %s201_s30 = scalar_lea.vmem (!%p193_p9), [#allocation2], %s677_s29  ;;  %s678_s29 = smul.u32 (!%p193_p9), 192, %s199_s28 }
  0x1f   : > { %v745_v6 = vmov 0   ;;  %v706_v7 = vld [vmem:[%s201_s30 + $0x24] ss:$8 sps:$4 sm:$0xff]   ;;  %v708_v8 = vld [vmem:[%s201_s30 + $0x20] ss:$8 sps:$4 sm:$0xff]   ;;  %vm374_vm0 = vcmask 392192  }
  0x20   : > { %425 = vmatprep.mubr.bf16.mxu0 %v745_v6  ;;  %455 = vmatprep.mubr.bf16.mxu1 %v745_v6  ;;  %v709_v9 = vld [vmem:[%s201_s30 + $0x14] ss:$8 sps:$4 sm:$0xff]   ;;  %v711_v10 = vld [vmem:[%s201_s30 + $0x10] ss:$8 sps:$4 sm:$0xff]   ;;  %v712_v11 = vld [vmem:[%s201_s30 + $0x4] ss:$8 sps:$4 sm:$0xff]  }
  0x21   : > { %705 = vset.pattern.permute.xlu1 %v745_v6  ;;  %704 = vset.pattern.permute.xlu0 %v745_v6  ;;  %v244_v12 = vld [vmem:[%s976_s2 + $0x10] sm:$0xff]  ;;  %v242_v13 = vld [vmem:[%s976_s2] sm:$0xff]  ;;  %v716_v16 = vld [vmem:[%s975_s1 + $0x18] sm:$0xff]   ;;  %s669_s12 = sshll.u32 (%p796_p5), %s639_s15, 4 }
  0x22   : > { %403 = vmatprep.subr.bf16.mxu0 %v706_v7  ;;  %670 = vmatprep.subr.bf16.mxu1 %v706_v7  ;;  %v714_v14 = vld [vmem:[%s201_s30] ss:$8 sps:$4 sm:$0xff]   ;;  %s877_s30 = scalar_lea.vmem [#allocation3], %s678_s29  ;;  %s917_s20 = scalar_lea.vmem (%p796_p5), %s977_s3, %s669_s12 }
  0x23   : > { %404 = vmatpush1.bf16.msra.mxu0 %v708_v8  ;;  %673 = vmatpush1.bf16.msra.mxu1 %v708_v8  ;;  %v715_v15 = vld [vmem:[%s975_s1] sm:$0xff]   ;;  %v245_v17 = vld [vmem:[%s976_s2 + $0x18] sm:$0xff]  ;;  %v243_v18 = vld [vmem:[%s976_s2 + $0x8] sm:$0xff] }
  0x24   : > { %405 = vmatprep.subr.bf16.mxu0 %v709_v9  ;;  %671 = vmatprep.subr.bf16.mxu1 %v709_v9  ;;  %v247_v19 = vld [vmem:[%s976_s2 + $0x28] sm:$0xff]  ;;  %v246_v20 = vld [vmem:[%s976_s2 + $0x20] sm:$0xff]  ;;  %v249_v23 = vld [vmem:[%s976_s2 + $0x38] sm:$0xff] }
  0x25   : > { %266 = vperm.xlu1 %705, %v244_v12   ;;  %256 = vperm.xlu0 %704, %v242_v13   ;;  %v717_v21 = vld [vmem:[%s975_s1 + $0x8] sm:$0xff]   ;;  %v718_v22 = vld [vmem:[%s975_s1 + $0x20] sm:$0xff]   ;;  %v248_v24 = vld [vmem:[%s976_s2 + $0x30] sm:$0xff] }
  0x26   : > { %v251_v25 = vld [vmem:[%s976_s2 + $0x48] sm:$0xff]  ;;  %v250_v26 = vld [vmem:[%s976_s2 + $0x40] sm:$0xff]  ;;  %v719_v27 = vld [vmem:[%s975_s1 + $0x10] sm:$0xff]  }
  0x27   : > { %406 = vmatpush1.bf16.msra.mxu0 %v711_v10  ;;  %674 = vmatpush1.bf16.msra.mxu1 %v711_v10  ;;  %v720_v28 = vld [vmem:[%s975_s1 + $0x28] sm:$0xff]   ;;  %v253_v29 = vld [vmem:[%s976_s2 + $0x58] sm:$0xff]  ;;  %v252_v30 = vld [vmem:[%s976_s2 + $0x50] sm:$0xff] }
  0x28   : > { %407 = vmatprep.subr.bf16.mxu0 %v712_v11  ;;  %672 = vmatprep.subr.bf16.mxu1 %v712_v11 }
  0x29   : > { %271 = vperm.xlu1 %705, %v245_v17   ;;  %261 = vperm.xlu0 %704, %v243_v18  }
  0x2b   : > { %408 = vmatpush1.bf16.msra.mxu0 %v714_v14  ;;  %675 = vmatpush1.bf16.msra.mxu1 %v714_v14 }
  0x2d   : > { %281 = vperm.xlu1 %705, %v247_v19   ;;  %276 = vperm.xlu0 %704, %v246_v20  }
  0x2e   : > { %658 = vmatmul.mubr.msk.bf16.vlgmr.msra.gmra.mxu0 %vm374_vm0, %v715_v15  ;;  %661 = vmatmul.mubr.msk.bf16.vlgmr.msra.gmra.mxu1 %vm374_vm0, %v716_v16 }
  0x2f   : > { %435 = vmatprep.mubr.bf16.mxu0 %v745_v6  ;;  %465 = vmatprep.mubr.bf16.mxu1 %v745_v6 }
  0x31   : > { %291 = vperm.xlu1 %705, %v249_v23   ;;  %286 = vperm.xlu0 %704, %v248_v24  }
  0x35   : > { %301 = vperm.xlu1 %705, %v251_v25   ;;  %296 = vperm.xlu0 %704, %v250_v26  }
  0x36   : > { %659 = vmatmul.mubr.msk.bf16.gmra.mxu0 %vm374_vm0, %v717_v21  ;;  %662 = vmatmul.mubr.msk.bf16.gmra.mxu1 %vm374_vm0, %v718_v22 }
  0x37   : > { %445 = vmatprep.mubr.bf16.mxu0 %v745_v6  ;;  %475 = vmatprep.mubr.bf16.mxu1 %v745_v6 }
  0x39   : > { %311 = vperm.xlu1 %705, %v253_v29   ;;  %306 = vperm.xlu0 %704, %v252_v30  }
  0x3e   : > { %660 = vmatmul.mubr.msk.bf16.gmra.mxu0 %vm374_vm0, %v719_v27  ;;  %663 = vmatmul.mubr.msk.bf16.gmra.mxu1 %vm374_vm0, %v720_v28 }
  0xa0   : > { %v257_v31 = vpop.permute.xlu0 %256  ;;  %v267_v32 = vpop.permute.xlu1 %266 }
  0xa4   : > { %v262_v33 = vpop.permute.xlu0 %261  ;;  %v272_v34 = vpop.permute.xlu1 %271 }
  0xa8   : > { %v871_v35 = vpop.permute.xlu0 %276  ;;  %v875_v36 = vpop.permute.xlu1 %281 }
  0xac   : > { %v287_v37 = vpop.permute.xlu0 %286  ;;  %v292_v44 = vpop.permute.xlu1 %291 }
  0xb0   : > { %v297_v53 = vpop.permute.xlu0 %296  ;;  %v302_v62 = vpop.permute.xlu1 %301 }
  0xb4   : > { %v307_v7 = vpop.permute.xlu0 %306  ;;  %v312_v16 = vpop.permute.xlu1 %311 }
  0xee   : > { %v427_v38 = vpop.f32.mrf.mxu0  ;;  %v457_v39 = vpop.f32.mrf.mxu1 }
  0xef   : > { %v428_v40 = vadd.f32 %v427_v38, %v257_v31  ;;  %v458_v41 = vadd.f32 %v457_v39, %v287_v37 }
  0xf0   : > { %v429_v42 = vpop.f32.mrf.mxu0  ;;  %v459_v43 = vpop.f32.mrf.mxu1 }
  0xf1   : > { %486 = vst [vmem:[%s877_s30] sm:$0xff] %v428_v40  ;;  %498 = vst [vmem:[%s877_s30 + $0x60] sm:$0xff] %v458_v41  ;;  %v430_v45 = vadd.f32 %v429_v42, %v257_v31  ;;  %v460_v46 = vadd.f32 %v459_v43, %v287_v37 }
  0xf2   : > { %v431_v47 = vpop.f32.mrf.mxu0  ;;  %v461_v48 = vpop.f32.mrf.mxu1 }
  0xf3   : > { %487 = vst [vmem:[%s877_s30 + $0x8] sm:$0xff] %v430_v45  ;;  %499 = vst [vmem:[%s877_s30 + $0x68] sm:$0xff] %v460_v46  ;;  %v432_v49 = vadd.f32 %v431_v47, %v262_v33  ;;  %v462_v50 = vadd.f32 %v461_v48, %v292_v44 }
  0xf4   : > { %v433_v51 = vpop.f32.mrf.mxu0  ;;  %v463_v52 = vpop.f32.mrf.mxu1 }
  0xf5   : > { %488 = vst [vmem:[%s877_s30 + $0x10] sm:$0xff] %v432_v49  ;;  %500 = vst [vmem:[%s877_s30 + $0x70] sm:$0xff] %v462_v50  ;;  %v434_v54 = vadd.f32 %v433_v51, %v262_v33  ;;  %v464_v55 = vadd.f32 %v463_v52, %v292_v44 }
  0xf6   : > { %v437_v56 = vpop.f32.mrf.mxu0  ;;  %v467_v57 = vpop.f32.mrf.mxu1 }
  0xf7   : > { %489 = vst [vmem:[%s877_s30 + $0x18] sm:$0xff] %v434_v54  ;;  %501 = vst [vmem:[%s877_s30 + $0x78] sm:$0xff] %v464_v55  ;;  %v438_v58 = vadd.f32 %v437_v56, %v267_v32  ;;  %v468_v59 = vadd.f32 %v467_v57, %v297_v53 }
  0xf8   : > { %v439_v60 = vpop.f32.mrf.mxu0  ;;  %v469_v61 = vpop.f32.mrf.mxu1  ;;  %v532_v27 = vld [vmem:[%s877_s30] sm:$0xff] (%p796_p5) }
  0xf9   : > { %490 = vst [vmem:[%s877_s30 + $0x20] sm:$0xff] %v438_v58  ;;  %502 = vst [vmem:[%s877_s30 + $0x80] sm:$0xff] %v468_v59  ;;  %v440_v63 = vadd.f32 %v439_v60, %v267_v32  ;;  %v470_v0 = vadd.f32 %v469_v61, %v297_v53  ;;  %v556_v39 = vld [vmem:[%s877_s30 + $0x60] sm:$0xff] (%p796_p5) }
  0xfa   : > { %v441_v1 = vpop.f32.mrf.mxu0  ;;  %v471_v2 = vpop.f32.mrf.mxu1  ;;  %v534_v28 = vld [vmem:[%s877_s30 + $0x8] sm:$0xff] (%p796_p5)  ;;  %533 = vst [vmem:[%s917_s20] sm:$0xff] (%p796_p5), %v532_v27  ;;  %557 = vst [vmem:[%s917_s20 + $0xc0] sm:$0xff] (%p796_p5), %v556_v39 }
  0xfb   : > { %491 = vst [vmem:[%s877_s30 + $0x28] sm:$0xff] %v440_v63  ;;  %503 = vst [vmem:[%s877_s30 + $0x88] sm:$0xff] %v470_v0  ;;  %v442_v3 = vadd.f32 %v441_v1, %v272_v34  ;;  %v472_v4 = vadd.f32 %v471_v2, %v302_v62  ;;  %v558_v40 = vld [vmem:[%s877_s30 + $0x68] sm:$0xff] (%p796_p5) }
  0xfc   : > { %v443_v5 = vpop.f32.mrf.mxu0  ;;  %v473_v6 = vpop.f32.mrf.mxu1  ;;  %v536_v29 = vld [vmem:[%s877_s30 + $0x10] sm:$0xff] (%p796_p5)  ;;  %535 = vst [vmem:[%s917_s20 + $0x8] sm:$0xff] (%p796_p5), %v534_v28  ;;  %559 = vst [vmem:[%s917_s20 + $0xc8] sm:$0xff] (%p796_p5), %v558_v40 }
  0xfd   : > { %492 = vst [vmem:[%s877_s30 + $0x30] sm:$0xff] %v442_v3  ;;  %504 = vst [vmem:[%s877_s30 + $0x90] sm:$0xff] %v472_v4  ;;  %v444_v8 = vadd.f32 %v443_v5, %v272_v34  ;;  %v474_v9 = vadd.f32 %v473_v6, %v302_v62  ;;  %v560_v41 = vld [vmem:[%s877_s30 + $0x70] sm:$0xff] (%p796_p5) }
  0xfe   : > { %v447_v10 = vpop.f32.mrf.mxu0  ;;  %v477_v11 = vpop.f32.mrf.mxu1  ;;  %v538_v30 = vld [vmem:[%s877_s30 + $0x18] sm:$0xff] (%p796_p5)  ;;  %537 = vst [vmem:[%s917_s20 + $0x20] sm:$0xff] (%p796_p5), %v536_v29  ;;  %561 = vst [vmem:[%s917_s20 + $0xe0] sm:$0xff] (%p796_p5), %v560_v41 }
  0xff   : > { %493 = vst [vmem:[%s877_s30 + $0x38] sm:$0xff] %v444_v8  ;;  %505 = vst [vmem:[%s877_s30 + $0x98] sm:$0xff] %v474_v9  ;;  %v448_v12 = vadd.f32 %v447_v10, %v871_v35  ;;  %v478_v13 = vadd.f32 %v477_v11, %v307_v7  ;;  %v562_v42 = vld [vmem:[%s877_s30 + $0x78] sm:$0xff] (%p796_p5) }
 0x100   : > { %v449_v14 = vpop.f32.mrf.mxu0  ;;  %v479_v15 = vpop.f32.mrf.mxu1  ;;  %v540_v31 = vld [vmem:[%s877_s30 + $0x20] sm:$0xff] (%p796_p5)  ;;  %539 = vst [vmem:[%s917_s20 + $0x28] sm:$0xff] (%p796_p5), %v538_v30  ;;  %563 = vst [vmem:[%s917_s20 + $0xe8] sm:$0xff] (%p796_p5), %v562_v42 }
 0x101   : > { %494 = vst [vmem:[%s877_s30 + $0x40] sm:$0xff] %v448_v12  ;;  %506 = vst [vmem:[%s877_s30 + $0xa0] sm:$0xff] %v478_v13  ;;  %v450_v17 = vadd.f32 %v449_v14, %v871_v35  ;;  %v480_v18 = vadd.f32 %v479_v15, %v307_v7  ;;  %v564_v43 = vld [vmem:[%s877_s30 + $0x80] sm:$0xff] (%p796_p5) }
 0x102   : > { %v451_v19 = vpop.f32.mrf.mxu0  ;;  %v481_v20 = vpop.f32.mrf.mxu1  ;;  %v542_v32 = vld [vmem:[%s877_s30 + $0x28] sm:$0xff] (%p796_p5)  ;;  %541 = vst [vmem:[%s917_s20 + $0x40] sm:$0xff] (%p796_p5), %v540_v31  ;;  %565 = vst [vmem:[%s917_s20 + $0x100] sm:$0xff] (%p796_p5), %v564_v43 }
 0x103   : > { %495 = vst [vmem:[%s877_s30 + $0x48] sm:$0xff] %v450_v17  ;;  %507 = vst [vmem:[%s877_s30 + $0xa8] sm:$0xff] %v480_v18  ;;  %v452_v21 = vadd.f32 %v451_v19, %v875_v36  ;;  %v482_v22 = vadd.f32 %v481_v20, %v312_v16  ;;  %516 = sbr.rel (!%p796_p5) target bundleno = 273 (0x111), region = 74  ;;  %v566_v44 = vld [vmem:[%s877_s30 + $0x88] sm:$0xff] (%p796_p5) }
 0x104   : > { %v453_v23 = vpop.f32.mrf.mxu0  ;;  %v483_v24 = vpop.f32.mrf.mxu1  ;;  %543 = vst [vmem:[%s917_s20 + $0x48] sm:$0xff] (%p796_p5), %v542_v32  ;;  %v544_v33 = vld [vmem:[%s877_s30 + $0x30] sm:$0xff] (%p796_p5)  ;;  %567 = vst [vmem:[%s917_s20 + $0x108] sm:$0xff] (%p796_p5), %v566_v44 }
 0x105   : > { %496 = vst [vmem:[%s877_s30 + $0x50] sm:$0xff] %v452_v21  ;;  %508 = vst [vmem:[%s877_s30 + $0xb0] sm:$0xff] %v482_v22  ;;  %v454_v25 = vadd.f32 %v453_v23, %v875_v36  ;;  %v484_v26 = vadd.f32 %v483_v24, %v312_v16  ;;  %v568_v45 = vld [vmem:[%s877_s30 + $0x90] sm:$0xff] (%p796_p5) }
 0x106   : > { %v546_v34 = vld [vmem:[%s877_s30 + $0x38] sm:$0xff] (%p796_p5)  ;;  %545 = vst [vmem:[%s917_s20 + $0x60] sm:$0xff] (%p796_p5), %v544_v33  ;;  %569 = vst [vmem:[%s917_s20 + $0x120] sm:$0xff] (%p796_p5), %v568_v45 }
 0x107   : > { %497 = vst [vmem:[%s877_s30 + $0x58] sm:$0xff] %v454_v25  ;;  %509 = vst [vmem:[%s877_s30 + $0xb8] sm:$0xff] %v484_v26  ;;  %v570_v46 = vld [vmem:[%s877_s30 + $0x98] sm:$0xff] (%p796_p5) }
 0x108   : > { %v548_v35 = vld [vmem:[%s877_s30 + $0x40] sm:$0xff]  ;;  %547 = vst [vmem:[%s917_s20 + $0x68] sm:$0xff] %v546_v34  ;;  %571 = vst [vmem:[%s917_s20 + $0x128] sm:$0xff] %v570_v46 }
 0x109   : > { %549 = vst [vmem:[%s917_s20 + $0x80] sm:$0xff] %v548_v35  ;;  %v572_v47 = vld [vmem:[%s877_s30 + $0xa0] sm:$0xff] }
 0x10a   : > { %v550_v36 = vld [vmem:[%s877_s30 + $0x48] sm:$0xff]  ;;  %573 = vst [vmem:[%s917_s20 + $0x140] sm:$0xff] %v572_v47 }
 0x10b   : > { %551 = vst [vmem:[%s917_s20 + $0x88] sm:$0xff] %v550_v36  ;;  %v574_v48 = vld [vmem:[%s877_s30 + $0xa8] sm:$0xff] }
 0x10c   : > { %v552_v37 = vld [vmem:[%s877_s30 + $0x50] sm:$0xff]  ;;  %575 = vst [vmem:[%s917_s20 + $0x148] sm:$0xff] %v574_v48 }
 0x10d   : > { %553 = vst [vmem:[%s917_s20 + $0xa0] sm:$0xff] %v552_v37  ;;  %v576_v49 = vld [vmem:[%s877_s30 + $0xb0] sm:$0xff] }
 0x10e   : > { %v554_v38 = vld [vmem:[%s877_s30 + $0x58] sm:$0xff]  ;;  %577 = vst [vmem:[%s917_s20 + $0x160] sm:$0xff] %v576_v49 }
 0x10f   : > { %555 = vst [vmem:[%s917_s20 + $0xa8] sm:$0xff] %v554_v38  ;;  %v578_v50 = vld [vmem:[%s877_s30 + $0xb8] sm:$0xff] }
 0x110   : > { %579 = vst [vmem:[%s917_s20 + $0x168] sm:$0xff] %v578_v50 }
 0x111 PF: > { %p10_p10 = scmp.ge.s32.totalorder %s783_s16, 4   ;;  %s979_s12 = smov %s739_s13 }
 0x112   : > { %s980_s13 = smov %s794_s19  ;;  %s981_s14 = smov %s783_s16 }
 0x113   :  { %12 = sbr.rel (!%p10_p10) target bundleno = 2 (0x2), region = 128 }

</bundles_post_ra>
